<compile_context>
chip_gen: v6e
topology: v6e:2x2x1
jax: 0.10.0
libtpu: 0.0.40
codegen_flags: <defaults>
</compile_context>

<pallas_src>
import jax
import jax.numpy as jnp
import numpy as np
from jax.experimental import pallas as pl
from jax.experimental.pallas import tpu as pltpu

# ---------------- config ----------------
IN_DIM = 2
MLP_CHANS = (32, 32)
FIRST_OMEGA_0 = 30.0
HIDDEN_OMEGA_0 = 30.0
HEAD_OUT = 3

H0, H1 = MLP_CHANS

LANE = 128                      # rows-per-tile granularity (lane axis)
TM_MAX = 16 * 1024              # perf review: 16K-32K; 16K keeps scratch + sin-chain
                                # temporaries comfortably inside every chip's VMEM
VMEM_LIMIT_BYTES = 48 * 1024 * 1024  # <= 48 MiB: fine on v5e/v6e (128 MiB) and v7x (64 MiB)


# ---------------- kernel ----------------
def ifm_mlp_kernel(x_ref, w0a_ref, w1a_ref, wha_ref, o_ref, xa_ref, h0_ref, h1_ref):
    # x_ref: (IN_DIM, tm) tile, rows on lanes. Augmented weights are tiny and resident.
    tm = x_ref.shape[1]
    ones_row = jnp.ones((1, tm), jnp.float32)

    # Augmented input tile: rows [0, IN_DIM) = features, last row = 1.0 so the bias
    # is just the last column of w0a (bias add moved onto the idle MXU).
    xa_ref[pl.ds(0, IN_DIM), :] = x_ref[...]
    xa_ref[pl.ds(IN_DIM, 1), :] = ones_row

    # SineLayer 0 (omega_0 pre-folded into w0a) + ReLU.
    # nn.Dropout(cfg.dropout): identity in eval mode -> omitted.
    z0 = jnp.dot(w0a_ref[...], xa_ref[...], preferred_element_type=jnp.float32)
    h0_ref[pl.ds(0, H0), :] = jnp.maximum(jnp.sin(z0), 0.0)
    h0_ref[pl.ds(H0, 1), :] = ones_row

    # SineLayer 1 (omega_0 pre-folded into w1a) + ReLU.
    z1 = jnp.dot(w1a_ref[...], h0_ref[...], preferred_element_type=jnp.float32)
    h1_ref[pl.ds(0, H1), :] = jnp.maximum(jnp.sin(z1), 0.0)
    h1_ref[pl.ds(H1, 1), :] = ones_row

    # Head (bias folded): (HEAD_OUT, tm) store is lane-dense.
    o_ref[...] = jnp.dot(wha_ref[...], h1_ref[...], preferred_element_type=jnp.float32)


# ---------------- tiling helper ----------------
def _choose_tiling(m_rows):
    """Largest lane-aligned row tile <= TM_MAX. If more than one grid step is
    needed, round the step count up to an even number so v7x's two TensorCores
    (grid sharded via dimension_semantics=('parallel',)) get equal work."""
    m_lane = max(LANE, pl.cdiv(m_rows, LANE) * LANE)
    if m_lane <= TM_MAX:
        return m_lane, m_lane                      # single big tile, single step
    steps = pl.cdiv(m_lane, TM_MAX)
    if steps % 2:
        steps += 1                                 # even step count for v7x megacore
    tm = pl.cdiv(m_lane, steps * LANE) * LANE
    return tm, steps * tm


# ---------------- parameter prep (one-time, O(KiB)) ----------------
def prepare_kernel_params(params):
    """Transpose to feature-major (out, in), fold omega_0 into the sine-layer
    weights, and append the bias as an extra column (bias folded into the matmul)."""
    w0, b0, w1, b1, wh, bh = params
    w0a = jnp.concatenate(
        [(FIRST_OMEGA_0 * w0).T, (FIRST_OMEGA_0 * b0).reshape(-1, 1)], axis=1
    ).astype(jnp.float32)                                   # (H0, IN_DIM + 1)
    w1a = jnp.concatenate(
        [(HIDDEN_OMEGA_0 * w1).T, (HIDDEN_OMEGA_0 * b1).reshape(-1, 1)], axis=1
    ).astype(jnp.float32)                                   # (H1, H0 + 1)
    wha = jnp.concatenate(
        [wh.T, bh.reshape(-1, 1)], axis=1
    ).astype(jnp.float32)                                   # (HEAD_OUT, H1 + 1)
    return (w0a, w1a, wha)


# ---------------- feature-major core (no layout conversion) ----------------
def ifm_mlp_feature_major(x_t, kparams):
    """x_t: (IN_DIM, M) feature-major activations, f32. Returns (HEAD_OUT, M).
    Use this entry point directly when the producer/consumer can supply/accept
    feature-major data — it has no wrapper-side transposes at all."""
    w0a, w1a, wha = kparams
    _, M = x_t.shape

    tm, m_pad = _choose_tiling(M)
    if m_pad != M:
        x_t = jnp.pad(x_t, ((0, 0), (0, m_pad - M)))
    grid = (m_pad // tm,)

    cost = pl.CostEstimate(
        flops=2 * ((IN_DIM + 1) * H0 + (H0 + 1) * H1 + (H1 + 1) * HEAD_OUT) * m_pad,
        transcendentals=(H0 + H1) * m_pad,
        bytes_accessed=(IN_DIM + HEAD_OUT) * 4 * m_pad,
    )

    out_t = pl.pallas_call(
        ifm_mlp_kernel,
        out_shape=jax.ShapeDtypeStruct((HEAD_OUT, m_pad), jnp.float32),
        grid_spec=pltpu.PrefetchScalarGridSpec(
            num_scalar_prefetch=0,
            grid=grid,
            in_specs=[
                pl.BlockSpec((IN_DIM, tm), lambda i: (0, i)),          # X^T tile
                pl.BlockSpec((H0, IN_DIM + 1), lambda i: (0, 0)),      # W0 | b0 (omega-folded)
                pl.BlockSpec((H1, H0 + 1), lambda i: (0, 0)),          # W1 | b1 (omega-folded)
                pl.BlockSpec((HEAD_OUT, H1 + 1), lambda i: (0, 0)),    # Wh | bh
            ],
            out_specs=pl.BlockSpec((HEAD_OUT, tm), lambda i: (0, i)),
            scratch_shapes=[
                pltpu.VMEM((IN_DIM + 1, tm), jnp.float32),   # x_aug (with ones row)
                pltpu.VMEM((H0 + 1, tm), jnp.float32),       # h0_aug (with ones row)
                pltpu.VMEM((H1 + 1, tm), jnp.float32),       # h1_aug (with ones row)
            ],
        ),
        compiler_params=pltpu.CompilerParams(
            dimension_semantics=("parallel",),
            vmem_limit_bytes=VMEM_LIMIT_BYTES,
        ),
        cost_estimate=cost,
    )(x_t.astype(jnp.float32), w0a, w1a, wha)

    return out_t[:, :M]


# ---------------- module-compatible wrapper ----------------
def ifm_mlp_forward(x, params):
    """x: (batch, seq, IN_DIM) float32. Returns (batch, seq, HEAD_OUT) float32.
    Matches IFMMLPModel.forward semantics (eval mode, ReLU activation)."""
    kparams = prepare_kernel_params(params)
    B, S, D = x.shape
    assert D == IN_DIM
    M = B * S

    # TODO(synk): the two layout conversions below (batch-major <-> feature-major)
    # are plain XLA copies outside the kernel; callers that can produce/consume
    # feature-major (IN_DIM, M)/(HEAD_OUT, M) tensors should call
    # ifm_mlp_feature_major directly and skip them (an in-kernel even/odd-lane
    # de-interleave is possible follow-up work).
    x_t = x.reshape(M, D).astype(jnp.float32).T              # (IN_DIM, M)
    out_t = ifm_mlp_feature_major(x_t, kparams)              # (HEAD_OUT, M)
    return out_t.T.reshape(B, S, HEAD_OUT)


# ---------------- deterministic param init (mirrors SIREN init) ----------------
def init_params(key):
    ks = jax.random.split(key, 6)

    # layer 0: is_first -> U(-1/in, 1/in)
    lim0 = 1.0 / IN_DIM
    w0 = jax.random.uniform(ks[0], (IN_DIM, MLP_CHANS[0]), jnp.float32, -lim0, lim0)
    b0 = jax.random.uniform(ks[1], (1, MLP_CHANS[0]), jnp.float32, -lim0, lim0)

    # layer 1: U(-sqrt(6/in)/omega, +sqrt(6/in)/omega)
    lim1 = np.sqrt(6.0 / MLP_CHANS[0]) / HIDDEN_OMEGA_0
    w1 = jax.random.uniform(ks[2], (MLP_CHANS[0], MLP_CHANS[1]), jnp.float32, -lim1, lim1)
    b1 = jax.random.uniform(ks[3], (1, MLP_CHANS[1]), jnp.float32, -lim1, lim1)

    # head: U(-sqrt(6/out_dim)/hidden_omega, ...)
    limh = np.sqrt(6.0 / MLP_CHANS[1]) / HIDDEN_OMEGA_0
    wh = jax.random.uniform(ks[4], (MLP_CHANS[1], HEAD_OUT), jnp.float32, -limh, limh)
    bh = jax.random.uniform(ks[5], (1, HEAD_OUT), jnp.float32, -limh, limh)

    return (w0, b0, w1, b1, wh, bh)


# ---------------- float64 numpy reference ----------------
def ref_forward_np(x, params):
    w0, b0, w1, b1, wh, bh = [np.asarray(p, dtype=np.float64) for p in params]
    xs = np.asarray(x, dtype=np.float64)
    B, S, _ = xs.shape
    h = xs.reshape(-1, IN_DIM)
    h = np.maximum(np.sin(FIRST_OMEGA_0 * (h @ w0 + b0)), 0.0)
    h = np.maximum(np.sin(HIDDEN_OMEGA_0 * (h @ w1 + b1)), 0.0)
    y = h @ wh + bh
    return y.reshape(B, S, HEAD_OUT)


if __name__ == "__main__":
    key = jax.random.PRNGKey(0)
    k_x, k_p = jax.random.split(key)

    batch, seq = 2, 8
    x = jax.random.uniform(k_x, (batch, seq, IN_DIM), jnp.float32, -1.0, 1.0)
    params = init_params(k_p)

    out = ifm_mlp_forward(x, params)
    out = jax.block_until_ready(out)

    ref = ref_forward_np(np.asarray(x), params)
    # sin(omega * z) with omega = 30 amplifies f32 rounding ~30x per layer, so a
    # float64 reference is compared with a correspondingly relaxed tolerance
    # (real kernel bugs would show up as O(0.1-1) errors).
    np.testing.assert_allclose(np.asarray(out, np.float64), ref, rtol=2e-3, atol=2e-3)

    assert out.shape == (batch, seq, HEAD_OUT)
    print("KERNEL_OK")
</pallas_src>

<mosaic_0001>
module attributes {stable_mosaic.version = 11 : i64} {
  func.func @ifm_mlp_kernel(%arg0: i32, %arg1: memref<2x128xf32, #tpu.memory_space<vmem>>, %arg2: memref<32x3xf32, #tpu.memory_space<vmem>>, %arg3: memref<32x33xf32, #tpu.memory_space<vmem>>, %arg4: memref<3x33xf32, #tpu.memory_space<vmem>>, %arg5: memref<3x128xf32, #tpu.memory_space<vmem>>, %arg6: memref<3x128xf32, #tpu.memory_space<vmem>>, %arg7: memref<33x128xf32, #tpu.memory_space<vmem>>, %arg8: memref<33x128xf32, #tpu.memory_space<vmem>>) attributes {dimension_semantics = [#tpu.dimension_semantics<parallel>], iteration_bounds = array<i64: 1>, scalar_prefetch = 0 : i64, scratch_operands = 3 : i64, tpu.core_type = #tpu.core_type<tc>, window_params = [{transform_indices = @transform_0, window_bounds = array<i64: 2, 128>}, {pipeline_mode = #tpu.pipeline_mode<synchronous>, transform_indices = @transform_1, window_bounds = array<i64: 32, 3>}, {pipeline_mode = #tpu.pipeline_mode<synchronous>, transform_indices = @transform_2, window_bounds = array<i64: 32, 33>}, {pipeline_mode = #tpu.pipeline_mode<synchronous>, transform_indices = @transform_3, window_bounds = array<i64: 3, 33>}, {transform_indices = @transform_4, window_bounds = array<i64: 3, 128>}]} {
    %cst = arith.constant 1.000000e+00 : f32
    %0 = vector.broadcast %cst : f32 to vector<1x128xf32>
    %c0 = arith.constant 0 : index
    %c0_0 = arith.constant 0 : index
    %1 = vector.load %arg1[%c0, %c0_0] : memref<2x128xf32, #tpu.memory_space<vmem>>, vector<2x128xf32>
    %c0_1 = arith.constant 0 : index
    %c0_2 = arith.constant 0 : index
    %2 = vector.load %arg6[%c0_1, %c0_2] : memref<3x128xf32, #tpu.memory_space<vmem>>, vector<2x128xf32>
    tpu.vector_store %arg6[%c0_1, %c0_2], %1 {strides = array<i32>} : memref<3x128xf32, #tpu.memory_space<vmem>>, vector<2x128xf32>,
    %c2 = arith.constant 2 : index
    %c0_3 = arith.constant 0 : index
    %3 = vector.load %arg6[%c2, %c0_3] : memref<3x128xf32, #tpu.memory_space<vmem>>, vector<1x128xf32>
    tpu.vector_store %arg6[%c2, %c0_3], %0 {strides = array<i32>} : memref<3x128xf32, #tpu.memory_space<vmem>>, vector<1x128xf32>,
    %c0_4 = arith.constant 0 : index
    %c0_5 = arith.constant 0 : index
    %4 = vector.load %arg2[%c0_4, %c0_5] : memref<32x3xf32, #tpu.memory_space<vmem>>, vector<32x3xf32>
    %c0_6 = arith.constant 0 : index
    %c0_7 = arith.constant 0 : index
    %5 = vector.load %arg6[%c0_6, %c0_7] : memref<3x128xf32, #tpu.memory_space<vmem>>, vector<3x128xf32>
    %cst_8 = arith.constant dense<0.000000e+00> : vector<32x128xf32>
    %6 = tpu.matmul %4, %5, %cst_8 {dimension_numbers = #tpu.dot_dimension_numbers<[1], [0], [0], [1], [0, 0, 1, 1], [], []>} : vector<32x3xf32>, vector<3x128xf32>, vector<32x128xf32> -> vector<32x128xf32>
    %7 = math.sin %6 : vector<32x128xf32>
    %cst_9 = arith.constant 0.000000e+00 : f32
    %8 = vector.broadcast %cst_9 : f32 to vector<32x128xf32>
    %9 = arith.maximumf %7, %8 : vector<32x128xf32>
    %c0_10 = arith.constant 0 : index
    %c0_11 = arith.constant 0 : index
    %10 = vector.load %arg7[%c0_10, %c0_11] : memref<33x128xf32, #tpu.memory_space<vmem>>, vector<32x128xf32>
    tpu.vector_store %arg7[%c0_10, %c0_11], %9 {strides = array<i32>} : memref<33x128xf32, #tpu.memory_space<vmem>>, vector<32x128xf32>,
    %c32 = arith.constant 32 : index
    %c0_12 = arith.constant 0 : index
    %11 = vector.load %arg7[%c32, %c0_12] : memref<33x128xf32, #tpu.memory_space<vmem>>, vector<1x128xf32>
    tpu.vector_store %arg7[%c32, %c0_12], %0 {strides = array<i32>} : memref<33x128xf32, #tpu.memory_space<vmem>>, vector<1x128xf32>,
    %c0_13 = arith.constant 0 : index
    %c0_14 = arith.constant 0 : index
    %12 = vector.load %arg3[%c0_13, %c0_14] : memref<32x33xf32, #tpu.memory_space<vmem>>, vector<32x33xf32>
    %c0_15 = arith.constant 0 : index
    %c0_16 = arith.constant 0 : index
    %13 = vector.load %arg7[%c0_15, %c0_16] : memref<33x128xf32, #tpu.memory_space<vmem>>, vector<33x128xf32>
    %cst_17 = arith.constant dense<0.000000e+00> : vector<32x128xf32>
    %14 = tpu.matmul %12, %13, %cst_17 {dimension_numbers = #tpu.dot_dimension_numbers<[1], [0], [0], [1], [0, 0, 1, 1], [], []>} : vector<32x33xf32>, vector<33x128xf32>, vector<32x128xf32> -> vector<32x128xf32>
    %15 = math.sin %14 : vector<32x128xf32>
    %cst_18 = arith.constant 0.000000e+00 : f32
    %16 = vector.broadcast %cst_18 : f32 to vector<32x128xf32>
    %17 = arith.maximumf %15, %16 : vector<32x128xf32>
    %c0_19 = arith.constant 0 : index
    %c0_20 = arith.constant 0 : index
    %18 = vector.load %arg8[%c0_19, %c0_20] : memref<33x128xf32, #tpu.memory_space<vmem>>, vector<32x128xf32>
    tpu.vector_store %arg8[%c0_19, %c0_20], %17 {strides = array<i32>} : memref<33x128xf32, #tpu.memory_space<vmem>>, vector<32x128xf32>,
    %c32_21 = arith.constant 32 : index
    %c0_22 = arith.constant 0 : index
    %19 = vector.load %arg8[%c32_21, %c0_22] : memref<33x128xf32, #tpu.memory_space<vmem>>, vector<1x128xf32>
    tpu.vector_store %arg8[%c32_21, %c0_22], %0 {strides = array<i32>} : memref<33x128xf32, #tpu.memory_space<vmem>>, vector<1x128xf32>,
    %c0_23 = arith.constant 0 : index
    %c0_24 = arith.constant 0 : index
    %20 = vector.load %arg4[%c0_23, %c0_24] : memref<3x33xf32, #tpu.memory_space<vmem>>, vector<3x33xf32>
    %c0_25 = arith.constant 0 : index
    %c0_26 = arith.constant 0 : index
    %21 = vector.load %arg8[%c0_25, %c0_26] : memref<33x128xf32, #tpu.memory_space<vmem>>, vector<33x128xf32>
    %cst_27 = arith.constant dense<0.000000e+00> : vector<3x128xf32>
    %22 = tpu.matmul %20, %21, %cst_27 {dimension_numbers = #tpu.dot_dimension_numbers<[1], [0], [0], [1], [0, 0, 1, 1], [], []>} : vector<3x33xf32>, vector<33x128xf32>, vector<3x128xf32> -> vector<3x128xf32>
    %c0_28 = arith.constant 0 : index
    %c0_29 = arith.constant 0 : index
    %23 = vector.load %arg5[%c0_28, %c0_29] : memref<3x128xf32, #tpu.memory_space<vmem>>, vector<3x128xf32>
    tpu.vector_store %arg5[%c0_28, %c0_29], %22 {strides = array<i32>} : memref<3x128xf32, #tpu.memory_space<vmem>>, vector<3x128xf32>,
    return
  }
  func.func @transform_0(%arg0: i32) -> (i32, i32) {
    %c0_i32 = arith.constant 0 : i32
    %c0_i32_0 = arith.constant 0 : i32
    return %c0_i32, %arg0 : i32, i32
  }
  func.func @transform_1(%arg0: i32) -> (i32, i32) {
    %c0_i32 = arith.constant 0 : i32
    %c0_i32_0 = arith.constant 0 : i32
    %c0_i32_1 = arith.constant 0 : i32
    return %c0_i32, %c0_i32_0 : i32, i32
  }
  func.func @transform_2(%arg0: i32) -> (i32, i32) {
    %c0_i32 = arith.constant 0 : i32
    %c0_i32_0 = arith.constant 0 : i32
    %c0_i32_1 = arith.constant 0 : i32
    return %c0_i32, %c0_i32_0 : i32, i32
  }
  func.func @transform_3(%arg0: i32) -> (i32, i32) {
    %c0_i32 = arith.constant 0 : i32
    %c0_i32_0 = arith.constant 0 : i32
    %c0_i32_1 = arith.constant 0 : i32
    return %c0_i32, %c0_i32_0 : i32, i32
  }
  func.func @transform_4(%arg0: i32) -> (i32, i32) {
    %c0_i32 = arith.constant 0 : i32
    %c0_i32_0 = arith.constant 0 : i32
    return %c0_i32, %arg0 : i32, i32
  }
}

</mosaic_0001>

<bundles_post_ra>
// kernel: tpu_custom_call.1
= control target key start
LH: loop header
LB: loop body
LE: loop exit
PB: predicated region body
PF: predicated region fallthrough
CT: control target
= control target key end

     0   :  { %vm26_vm0 = vcmask 23552   ;;  %v1383_v2 = vmov 1.0   ;;  %s2077_s0 = inlined_call_operand.vmem [shape: f32[2,128], index: 0, kind: input, shape index: {}]   ;;  %s2078_s1 = inlined_call_operand.vmem [shape: f32[32,3], index: 1, kind: input, shape index: {}]   ;;  %s2079_s2 = inlined_call_operand.vmem [shape: f32[32,33], index: 2, kind: input, shape index: {}]   ;;  %s2080_s3 = inlined_call_operand.vmem [shape: f32[3,33], index: 3, kind: input, shape index: {}]   ;;  %s2081_s4 = inlined_call_operand.hbm [shape: f32[3,128], index: 4, kind: output, shape index: {}]  }
   0x1   :  { %v18_v0 = vld [vmem:[%s2077_s0] sm:$0x3]  ;;  %20 = vst [vmem:[#allocation2 + $0x2] sm:$0x1] %v1383_v2  ;;  %1088 = vst [vmem:[#allocation4 + $0x10] sm:$0x1] %v1383_v2 }
   0x2   :  { %v21_v1 = vld [vmem:[%s2078_s1] sm:$0xff]  ;;  %19 = vst [vmem:[#allocation2] sm:$0x3] %v18_v0  ;;  %552 = vst [vmem:[#allocation3 + $0x18] sm:$0x1] %v1383_v2 }
   0x3   :  { %1252 = vmatprep.mubr.msk.f32.mxu0 %vm26_vm0, %v21_v1 }
   0x4   :  { %9 = vsyncpa [#allocation6], 0  ;;  %vm39_vm1 = vcmask 1042432   ;;  %v22_v4 = vld [vmem:[%s2078_s1 + $0x8] sm:$0xff]  ;;  %v23_v5 = vld [vmem:[%s2078_s1 + $0x10] sm:$0xff]  ;;  %vm575_vm14 = vcmask 1040384  }
   0x5   :  { %v24_v6 = vld [vmem:[%s2078_s1 + $0x18] sm:$0xff]  ;;  %v1384_v34 = vmov 683565275   ;;  %v1385_v36 = vmov 2475754826   ;;  %s1392_s6 = smov [#allocation5]  }
   0x6   :  { %v1386_v38 = vmov 2131351028   ;;  %v1387_v40 = vmov 2102212464   ;;  %v1388_v42 = vmov 920167782  }
   0x7   :  { %v1389_v49 = vmov 1326507024   ;;  %s1178_s7 = sshll.u32 %s1392_s6, 4  ;;  %s1179_s7 = int_to_ptr.vmem [resolvable:$true] %s1178_s7 }
   0x8   :  { %s1361_s8 = scalar_lea.vmem %s1179_s7, 64  ;;  %p1366_p1 = scmp.lt.s32.totalorder %s1179_s7, %s1179_s7 }
   0x9   :  { %v25_v3 = vld [vmem:[#allocation2] sm:$0x7]  ;;  %p1362_p0 = scmp.ne.s32.totalorder %s1179_s7, %s1361_s8  ;;  %p1367_p2 = scmp.lt.s32.totalorder %s1361_s8, %s1361_s8 }
   0xa   :  { %1250 = vmatprep.subr.msk.mxu0 %vm39_vm1, %v25_v3 }
   0xb   :  { %1251 = vmatpush3.msk.msra.mxu0 %vm39_vm1, %v25_v3  ;;  %p1368_p3 = por %p1367_p2, %p1366_p1 }
   0xc   :  { %1253 = vmatmul.mubr.msk.f32.vlgmr.msra.gmra.mxu0 %vm26_vm0, %v22_v4 }
   0xd   :  { %1255 = vmatprep.mubr.msk.f32.mxu0 %vm26_vm0, %v23_v5  ;;  %p1369_p4 = pnand %p1368_p3, %p1362_p0 }
  0x10   :  { %1256 = vmatmul.mubr.msk.f32.gmra.mxu0 %vm26_vm0, %v24_v6 }
  0xcc   :  { %v1437_v7 = vpop.f32.mrf.mxu0 }
  0xcd   :  { %v232_v8 = vand.u32 2147483647, %v1437_v7  ;;  %v235_v9 = vand.u32 2139095040, %v1437_v7  ;;  %vm234_vm0 = vcmp.lt.s32.totalorder %v1437_v7, 0 }
  0xce   :  { %v1441_v10 = vpop.f32.mrf.mxu0 }
  0xcf   :  { %v236_v11 = vshrl.u32 %v235_v9, 23  ;;  %v239_v12 = vand.u32 8388607, %v232_v8  ;;  %v128_v13 = vand.u32 2147483647, %v1441_v10  ;;  %v131_v14 = vand.u32 2139095040, %v1441_v10 }
  0xd0   :  { %v1447_v15 = vpop.f32.mrf.mxu0 }
  0xd1   :  { %v1195_v16 = vadd.s32 4294967169, %v236_v11  ;;  %v132_v17 = vshrl.u32 %v131_v14, 23  ;;  %v135_v18 = vand.u32 8388607, %v128_v13  ;;  %v443_v19 = vand.u32 2139095040, %v1447_v15 }
  0xd2   :  { %v240_v21 = vor.u32 8388608, %v239_v12  ;;  %v440_v31 = vand.u32 2147483647, %v1447_v15 }
  0xd3   :  { %v242_v20 = vadd.s32 1, %v1195_v16  ;;  %v1191_v22 = vadd.s32 4294967169, %v132_v17  ;;  %v136_v23 = vor.u32 8388608, %v135_v18  ;;  %v444_v24 = vshrl.u32 %v443_v19, 23 }
  0xd4   :  { %v1452_v29 = vshll.u32 %v240_v21, 8 }
  0xd5   :  { %vm243_vm2 = vcmp.gt.s32.totalorder %v242_v20, 0  ;;  %v138_v26 = vadd.s32 1, %v1191_v22  ;;  %v1454_v30 = vshll.u32 %v136_v23, 8  ;;  %v1203_v32 = vadd.s32 4294967169, %v444_v24 }
  0xd6   :  { %v244_v25 = vsel %vm243_vm2, %v242_v20, 0 }
  0xd7   :  { %v245_v27 = vshrl.u32 %v244_v25, 5  ;;  %v246_v28 = vand.u32 31, %v244_v25  ;;  %vm139_vm3 = vcmp.gt.s32.totalorder %v138_v26, 0  ;;  %v450_v5 = vadd.s32 1, %v1203_v32 }
  0xd8   :  { %v140_v54 = vsel %vm139_vm3, %v138_v26, 0 }
  0xd9   :  { %v247_v33 = vsub.s32 32, %v246_v28  ;;  %v249_v35 = vshll.u32 %v1384_v34, %v246_v28  ;;  %v252_v37 = vshll.u32 %v1385_v36, %v246_v28  ;;  %v255_v39 = vshll.u32 %v1386_v38, %v246_v28 }
  0xda   :  { %v258_v41 = vshll.u32 %v1387_v40, %v246_v28  ;;  %v261_v43 = vshll.u32 %v1388_v42, %v246_v28  ;;  %vm264_vm4 = vcmp.lt.s32.totalorder %v245_v27, 1  ;;  %vm265_vm5 = vcmp.lt.s32.totalorder %v245_v27, 2 }
  0xdb   :  { %v250_v44 = vshrl.u32 %v1385_v36, %v247_v33  ;;  %v253_v45 = vshrl.u32 %v1386_v38, %v247_v33  ;;  %v256_v46 = vshrl.u32 %v1387_v40, %v247_v33  ;;  %v248_v47 = vshrl.u32 %v1384_v34, %v247_v33 }
  0xdc   :  { %v259_v48 = vshrl.u32 %v1388_v42, %v247_v33  ;;  %v262_v50 = vshrl.u32 %v1389_v49, %v247_v33  ;;  %vm266_vm6 = vcmp.lt.s32.totalorder %v245_v27, 3  ;;  %vm267_vm7 = vcmp.lt.s32.totalorder %v245_v27, 4 }
  0xdd   :  { %v251_v51 = vor.u32 %v250_v44, %v249_v35  ;;  %v254_v52 = vor.u32 %v253_v45, %v252_v37  ;;  %v257_v53 = vor.u32 %v256_v46, %v255_v39  ;;  %v142_v57 = vand.u32 31, %v140_v54 }
  0xde   :  { %v260_v55 = vor.u32 %v259_v48, %v258_v41  ;;  %v263_v56 = vor.u32 %v262_v50, %v261_v43  ;;  %v141_v11 = vshrl.u32 %v140_v54, 5  ;;  %vm451_vm13 = vcmp.gt.s32.totalorder %v450_v5, 0 }
  0xdf   :  { %v268_v58 = vsel %vm264_vm4, %v248_v47, %v251_v51  ;;  %v269_v59 = vsel %vm267_vm7, %v257_v53, 2102212464  ;;  %v272_v60 = vsel %vm264_vm4, %v251_v51, %v254_v52  ;;  %v276_v61 = vsel %vm264_vm4, %v254_v52, %v257_v53 }
  0xe0   :  { %v270_v62 = vsel %vm266_vm6, %v254_v52, %v269_v59  ;;  %v273_v63 = vsel %vm267_vm7, %v260_v55, 920167782  ;;  %v277_v0 = vsel %vm267_vm7, %v263_v56, 1326507024  ;;  %v143_v1 = vsub.s32 32, %v142_v57 }
  0xe1   :  { %v271_v2 = vsel %vm265_vm5, %v268_v58, %v270_v62  ;;  %v274_v3 = vsel %vm266_vm6, %v257_v53, %v273_v63  ;;  %v278_v4 = vsel %vm266_vm6, %v260_v55, %v277_v0  ;;  %v145_v12 = vshll.u32 %v1384_v34, %v142_v57 }
  0xe2   :  { %v275_v6 = vsel %vm265_vm5, %v272_v60, %v274_v3  ;;  %v279_v9 = vsel %vm265_vm5, %v276_v61, %v278_v4  ;;  %v287_v19 = vmul.u32 %v1452_v29, %v271_v2  ;;  %v146_v20 = vshrl.u32 %v1385_v36, %v143_v1 }
  0xe3   :  { %v1480_v14 = vmul.u32.u64.low %v1452_v29, %v279_v9  ;;  %v1481_v16 = vmul.u32.u64.high %v1452_v29, %v279_v9, %v1480_v14  ;;  %v1484_v17 = vmul.u32.u64.low %v1452_v29, %v275_v6  ;;  %v1485_v18 = vmul.u32.u64.high %v1452_v29, %v275_v6, %v1484_v17 }
  0xe4   :  { %v148_v21 = vshll.u32 %v1385_v36, %v142_v57  ;;  %v149_v22 = vshrl.u32 %v1386_v38, %v143_v1  ;;  %v151_v23 = vshll.u32 %v1386_v38, %v142_v57  ;;  %v152_v24 = vshrl.u32 %v1387_v40, %v143_v1 }
  0xe5   :  { %v154_v25 = vshll.u32 %v1387_v40, %v142_v57  ;;  %v155_v26 = vshrl.u32 %v1388_v42, %v143_v1  ;;  %v147_v27 = vor.u32 %v146_v20, %v145_v12  ;;  %v157_v32 = vshll.u32 %v1388_v42, %v142_v57 }
  0xe6   :  { %v150_v28 = vor.u32 %v149_v22, %v148_v21  ;;  %v158_v29 = vshrl.u32 %v1389_v49, %v143_v1  ;;  %vm289_vm8 = vc.u32 %v1481_v16, %v1484_v17  ;;  %v290_v33 = vadd.s32 1, %v1485_v18 }
  0xe7   :  { %v144_v35 = vshrl.u32 %v1384_v34, %v143_v1  ;;  %v153_v37 = vor.u32 %v152_v24, %v151_v23  ;;  %v156_v39 = vor.u32 %v155_v26, %v154_v25  ;;  %vm160_vm9 = vcmp.lt.s32.totalorder %v141_v11, 1  ;;  %v561_v1 = vld [vmem:[#allocation3 + $0x18] sm:$0x1] }
  0xe8   :  { %v159_v41 = vor.u32 %v158_v29, %v157_v32  ;;  %vm161_vm10 = vcmp.lt.s32.totalorder %v141_v11, 2  ;;  %v291_v43 = vsel %vm289_vm8, %v290_v33, %v1485_v18  ;;  %vm162_vm11 = vcmp.lt.s32.totalorder %v141_v11, 3  ;;  %1258 = vmatprep.subr.msk.mxu1 %vm575_vm14, %v561_v1 }
  0xe9   :  { %vm163_vm12 = vcmp.lt.s32.totalorder %v141_v11, 4  ;;  %v168_v44 = vsel %vm160_vm9, %v147_v27, %v150_v28  ;;  %v292_v45 = vadd.s32 %v291_v43, %v287_v19  ;;  %v172_v48 = vsel %vm160_vm9, %v150_v28, %v153_v37  ;;  %1259 = vmatpush3.msk.msra.mxu1 %vm575_vm14, %v561_v1 }
  0xea   :  { %v165_v46 = vsel %vm163_vm12, %v153_v37, 2102212464  ;;  %v169_v47 = vsel %vm163_vm12, %v156_v39, 920167782  ;;  %v164_v50 = vsel %vm160_vm9, %v144_v35, %v147_v27  ;;  %v173_v52 = vsel %vm163_vm12, %v159_v41, 1326507024 }
  0xeb   :  { %v170_v51 = vsel %vm162_vm11, %v153_v37, %v169_v47  ;;  %v293_v53 = vadd.s32 536870912, %v292_v45  ;;  %v166_v54 = vsel %vm162_vm11, %v150_v28, %v165_v46  ;;  %v174_v56 = vsel %vm162_vm11, %v156_v39, %v173_v52 }
  0xec   :  { %v171_v55 = vsel %vm161_vm10, %v168_v44, %v170_v51  ;;  %v175_v57 = vsel %vm161_vm10, %v172_v48, %v174_v56  ;;  %v447_v60 = vand.u32 8388607, %v440_v31  ;;  %v452_v0 = vsel %vm451_vm13, %v450_v5, 0  ;;  %v1525_v5 = vpop.f32.mrf.mxu0 }
  0xed   :  { %v1506_v58 = vmul.u32.u64.low %v1454_v30, %v171_v55  ;;  %v1507_v59 = vmul.u32.u64.high %v1454_v30, %v171_v55, %v1506_v58  ;;  %v1512_v61 = vshrl.u32 %v293_v53, 30  ;;  %v167_v2 = vsel %vm161_vm10, %v164_v50, %v166_v54 }
  0xee   :  { %v1515_v62 = vmul.u32.u64.low %v1454_v30, %v175_v57  ;;  %v1516_v63 = vmul.u32.u64.high %v1454_v30, %v175_v57, %v1515_v62  ;;  %v454_v3 = vand.u32 31, %v452_v0  ;;  %v448_v9 = vor.u32 8388608, %v447_v60 }
  0xef   :  { %v295_v4 = vshll.u32 %v1512_v61, 30  ;;  %v186_v6 = vadd.s32 1, %v1507_v59  ;;  %v183_v14 = vmul.u32 %v1454_v30, %v167_v2  ;;  %v339_v22 = vand.u32 2139095040, %v1525_v5 }
  0xf0   :  { %vm185_vm15 = vc.u32 %v1516_v63, %v1506_v58  ;;  %v455_v18 = vsub.s32 32, %v454_v3  ;;  %v1529_v21 = vshll.u32 %v448_v9, 8  ;;  %v1534_v26 = vshrl.u32 %v452_v0, 5 }
  0xf1   :  { %v296_v12 = vsub.s32 %v292_v45, %v295_v4  ;;  %v187_v11 = vsel %vm185_vm15, %v186_v6, %v1507_v59  ;;  %v466_v28 = vshll.u32 %v1387_v40, %v454_v3  ;;  %v457_v33 = vshll.u32 %v1384_v34, %v454_v3 }
  0xf2   :  { %v188_v20 = vadd.s32 %v187_v11, %v183_v14  ;;  %v458_v30 = vshrl.u32 %v1385_v36, %v455_v18  ;;  %v461_v25 = vshrl.u32 %v1386_v38, %v455_v18  ;;  %v464_v27 = vshrl.u32 %v1387_v40, %v455_v18 }
  0xf3   :  { %v298_v19 = vsub.s32 0, %v296_v12  ;;  %v467_v32 = vshrl.u32 %v1388_v42, %v455_v18  ;;  %v460_v35 = vshll.u32 %v1385_v36, %v454_v3  ;;  %v470_v37 = vshrl.u32 %v1389_v49, %v455_v18 }
  0xf4   :  { %v189_v24 = vadd.s32 536870912, %v188_v20  ;;  %v288_v39 = vadd.s32 %v1484_v17, %v1481_v16  ;;  %v463_v43 = vshll.u32 %v1386_v38, %v454_v3  ;;  %v459_v46 = vor.u32 %v458_v30, %v457_v33  ;;  %v553_v33 = vld [vmem:[%s2079_s2] sm:$0xff] }
  0xf5   :  { %v1196_v23 = vmin.u32 %v298_v19, %v296_v12  ;;  %v468_v44 = vor.u32 %v467_v32, %v466_v28  ;;  %v462_v47 = vor.u32 %v461_v25, %v460_v35  ;;  %v469_v48 = vshll.u32 %v1388_v42, %v454_v3 }
  0xf6   :  { %v1544_v41 = vshrl.u32 %v189_v24, 30  ;;  %v465_v51 = vor.u32 %v464_v27, %v463_v43  ;;  %vm475_vm1 = vcmp.lt.s32.totalorder %v1534_v26, 4  ;;  %v340_v52 = vshrl.u32 %v339_v22, 23 }
  0xf7   :  { %v300_v29 = vclz %v1196_v23  ;;  %v318_v16 = vsub.s32 4, %v1512_v61  ;;  %v471_v17 = vor.u32 %v470_v37, %v469_v48  ;;  %v481_v53 = vsel %vm475_vm1, %v468_v44, 920167782 }
  0xf8   :  { %v191_v50 = vshll.u32 %v1544_v41, 30  ;;  %v456_v56 = vshrl.u32 %v1384_v34, %v455_v18  ;;  %vm472_vm3 = vcmp.lt.s32.totalorder %v1534_v26, 1  ;;  %vm474_vm4 = vcmp.lt.s32.totalorder %v1534_v26, 3 }
  0xf9   :  { %v1197_v45 = vadd.s32 4294967294, %v300_v29  ;;  %v480_v60 = vsel %vm472_vm3, %v459_v46, %v462_v47  ;;  %vm473_vm5 = vcmp.lt.s32.totalorder %v1534_v26, 2  ;;  %v482_v0 = vsel %vm474_vm4, %v465_v51, %v481_v53 }
  0xfa   :  { %v1554_v55 = vsub.s32 %v188_v20, %v191_v50  ;;  %v484_v1 = vsel %vm472_vm3, %v462_v47, %v465_v51  ;;  %v485_v6 = vsel %vm475_vm1, %v471_v17, 1326507024  ;;  %v477_v14 = vsel %vm475_vm1, %v465_v51, 2102212464 }
  0xfb   :  { %vm1198_vm2 = vcmp.lt.s32.totalorder %v1197_v45, 0  ;;  %v483_v18 = vsel %vm473_vm5, %v480_v60, %v482_v0  ;;  %v486_v11 = vsel %vm474_vm4, %v468_v44, %v485_v6  ;;  %v1199_v22 = vadd.s32 4294967169, %v340_v52 }
  0xfc   :  { %v303_v54 = vsel %vm1198_vm2, 0, %v1197_v45  ;;  %v194_v62 = vsub.s32 0, %v1554_v55  ;;  %v319_v23 = vsel %vm234_vm0, %v318_v16, %v1512_v61  ;;  %v476_v30 = vsel %vm472_vm3, %v456_v56, %v459_v46 }
  0xfd   :  { %v304_v57 = vsub.s32 32, %v303_v54  ;;  %v308_v59 = vsub.s32 4294967266, %v303_v54  ;;  %v305_v2 = vshll.u32 %v296_v12, %v303_v54  ;;  %v487_v12 = vsel %vm473_vm5, %v484_v1, %v486_v11 }
  0xfe   :  { %v1192_v9 = vmin.u32 %v194_v62, %v1554_v55  ;;  %v336_v25 = vand.u32 2147483647, %v1525_v5  ;;  %v478_v28 = vsel %vm474_vm4, %v462_v47, %v477_v14  ;;  %vm1600_vm6 = vcmp.le.f32.partialorder %v232_v8, 0.7853982 }
  0xff   :  { %v306_v3 = vshrl.u32 %v288_v39, %v304_v57  ;;  %v309_v4 = vadd.s32 127, %v308_v59  ;;  %v1587_v32 = vmul.u32.u64.low %v1529_v21, %v487_v12  ;;  %v1588_v29 = vmul.u32.u64.high %v1529_v21, %v487_v12, %v1587_v32 }
 0x100   :  { %v196_v24 = vclz %v1192_v9  ;;  %v1594_v61 = vmul.u32.u64.low %v1529_v21, %v483_v18  ;;  %v1595_v37 = vmul.u32.u64.high %v1529_v21, %v483_v18, %v1594_v61  ;;  %v346_v39 = vadd.s32 1, %v1199_v22 }
 0x101   :  { %v307_v19 = vor.u32 %v306_v3, %v305_v2  ;;  %v310_v20 = vshll.u32 %v309_v4, 23  ;;  %vm562_vm7 = vcmask 269312   ;;  %v321_v46 = vsel %vm1600_vm6, 0, %v319_v23 }
 0x102   :  { %v1193_v35 = vadd.s32 4294967294, %v196_v24  ;;  %v479_v47 = vsel %vm473_vm5, %v476_v30, %v478_v28  ;;  %vm347_vm9 = vcmp.gt.s32.totalorder %v346_v39, 0  ;;  %1268 = vmatprep.mubr.msk.f32.mxu1 %vm562_vm7, %v553_v33  ;;  %vm497_vm10 = vc.u32 %v1588_v29, %v1594_v61 }
 0x103   :  { %v311_v27 = vor.u32 4788187, %v310_v20  ;;  %v314_v45 = vcvt.s32.f32 %v307_v19  ;;  %v343_v8 = vand.u32 8388607, %v336_v25  ;;  %v184_v51 = vadd.s32 %v1506_v58, %v1516_v63 }
 0x104   :  { %vm1194_vm8 = vcmp.lt.s32.totalorder %v1193_v35, 0  ;;  %v498_v17 = vadd.s32 1, %v1595_v37  ;;  %v325_v53 = vadd.s32 3, %v321_v46  ;;  %v495_v54 = vmul.u32 %v1529_v21, %v479_v47 }
 0x105   :  { %v312_v44 = vand.u32 2147483647, %v311_v27  ;;  %v199_v50 = vsel %vm1194_vm8, 0, %v1193_v35  ;;  %v348_v56 = vsel %vm347_vm9, %v346_v39, 0  ;;  %v214_v58 = vsub.s32 4, %v1544_v41 }
 0x106   :  { %v200_v52 = vsub.s32 32, %v199_v50  ;;  %v204_v16 = vsub.s32 4294967266, %v199_v50  ;;  %v201_v57 = vshll.u32 %v1554_v55, %v199_v50  ;;  %v499_v62 = vsel %vm497_vm10, %v498_v17, %v1595_v37 }
 0x107   :  { %v315_v48 = vmul.f32 %v314_v45, %v312_v44  ;;  %v500_v63 = vadd.s32 %v499_v62, %v495_v54  ;;  %v350_v1 = vand.u32 31, %v348_v56  ;;  %vm130_vm11 = vcmp.lt.s32.totalorder %v1441_v10, 0 }
 0x108   :  { %v202_v59 = vshrl.u32 %v184_v51, %v200_v52  ;;  %v205_v60 = vadd.s32 127, %v204_v16  ;;  %vm1628_vm12 = vcmp.le.f32.partialorder %v128_v13, 0.7853982  ;;  %v344_v14 = vor.u32 8388608, %v343_v8 }
 0x109   :  { %v316_v26 = vxor.u32 2147483648, %v315_v48  ;;  %v501_v55 = vadd.s32 536870912, %v500_v63  ;;  %v351_v4 = vsub.s32 32, %v350_v1  ;;  %v1632_v18 = vand.u32 3, %v325_v53 }
 0x10a   :  { %v203_v3 = vor.u32 %v202_v59, %v201_v57  ;;  %v206_v21 = vshll.u32 %v205_v60, 23  ;;  %v1637_v11 = vsel %vm130_vm11, %v214_v58, %v1544_v41  ;;  %v1645_v30 = vshrl.u32 %v348_v56, 5 }
 0x10b   :  { %v317_v0 = vsel %vm234_vm0, %v316_v26, %v315_v48  ;;  %v1639_v19 = vshrl.u32 %v501_v55, 30  ;;  %v354_v20 = vshrl.u32 %v1385_v36, %v351_v4  ;;  %v357_v13 = vshrl.u32 %v1386_v38, %v351_v4 }
 0x10c   :  { %v320_v2 = vsel %vm1600_vm6, %v1437_v7, %v317_v0  ;;  %v207_v9 = vor.u32 4788187, %v206_v21  ;;  %v210_v22 = vcvt.s32.f32 %v203_v3  ;;  %v360_v23 = vshrl.u32 %v1387_v40, %v351_v4 }
 0x10d   :  { %1329 = vcosq.f32 %v320_v2  ;;  %v503_v24 = vshll.u32 %v1639_v19, 30  ;;  %v353_v27 = vshll.u32 %v1384_v34, %v350_v1  ;;  %v359_v28 = vshll.u32 %v1386_v38, %v350_v1 }
 0x10e   :  { %1331 = vsinq.f32 %v320_v2  ;;  %v208_v12 = vand.u32 2147483647, %v207_v9  ;;  %v356_v32 = vshll.u32 %v1385_v36, %v350_v1  ;;  %v362_v33 = vshll.u32 %v1387_v40, %v350_v1 }
 0x10f   :  { %v363_v35 = vshrl.u32 %v1388_v42, %v351_v4  ;;  %v1652_v37 = vsub.s32 %v500_v63, %v503_v24  ;;  %v355_v39 = vor.u32 %v354_v20, %v353_v27  ;;  %v361_v43 = vor.u32 %v360_v23, %v359_v28 }
 0x110   :  { %v211_v41 = vmul.f32 %v210_v22, %v208_v12  ;;  %v366_v44 = vshrl.u32 %v1389_v49, %v351_v4  ;;  %v358_v46 = vor.u32 %v357_v13, %v356_v32  ;;  %v365_v48 = vshll.u32 %v1388_v42, %v350_v1 }
 0x111   :  { %v364_v47 = vor.u32 %v363_v35, %v362_v33  ;;  %vm328_vm13 = vcmp.eq.s32.totalorder %v1632_v18, 0  ;;  %vm331_vm15 = vcmp.eq.s32.totalorder %v1632_v18, 2  ;;  %v217_v50 = vsel %vm1628_vm12, 0, %v1637_v11 }
 0x112   :  { %v212_v45 = vxor.u32 2147483648, %v211_v41  ;;  %v506_v8 = vsub.s32 0, %v1652_v37  ;;  %v384_v51 = vshll.u32 %v344_v14, 8  ;;  %vm327_vm0 = vcmp.lt.s32.totalorder %v1632_v18, 2 }
 0x113   :  { %v367_v16 = vor.u32 %v366_v44, %v365_v48  ;;  %vm368_vm1 = vcmp.lt.s32.totalorder %v1645_v30, 1  ;;  %vm371_vm2 = vcmp.lt.s32.totalorder %v1645_v30, 4  ;;  %vm324_vm3 = vweird.f32 %v1437_v7 }
 0x114   :  { %v213_v52 = vsel %vm130_vm11, %v212_v45, %v211_v41  ;;  %v1204_v26 = vmin.u32 %v506_v8, %v1652_v37  ;;  %v352_v53 = vshrl.u32 %v1384_v34, %v351_v4  ;;  %v373_v54 = vsel %vm371_vm2, %v361_v43, 2102212464 }
 0x115   :  { %v216_v17 = vsel %vm1628_vm12, %v1441_v10, %v213_v52  ;;  %vm369_vm4 = vcmp.lt.s32.totalorder %v1645_v30, 2  ;;  %v376_v56 = vsel %vm368_vm1, %v355_v39, %v358_v46  ;;  %v377_v57 = vsel %vm371_vm2, %v364_v47, 920167782 }
 0x116   :  { %1333 = vcosq.f32 %v216_v17  ;;  %v508_v59 = vclz %v1204_v26  ;;  %vm370_vm5 = vcmp.lt.s32.totalorder %v1645_v30, 3  ;;  %v380_v60 = vsel %vm368_vm1, %v358_v46, %v361_v43 }
 0x117   :  { %1335 = vsinq.f32 %v216_v17  ;;  %v372_v0 = vsel %vm368_vm1, %v352_v53, %v355_v39  ;;  %v374_v58 = vsel %vm370_vm5, %v358_v46, %v373_v54  ;;  %v378_v63 = vsel %vm370_vm5, %v361_v43, %v377_v57 }
 0x118   :  { %v381_v1 = vsel %vm371_vm2, %v367_v16, 1326507024  ;;  %v1205_v21 = vadd.s32 4294967294, %v508_v59  ;;  %v379_v55 = vsel %vm369_vm4, %v376_v56, %v378_v63  ;;  %v221_v23 = vadd.s32 3, %v217_v50 }
 0x119   :  { %v382_v4 = vsel %vm370_vm5, %v364_v47, %v381_v1  ;;  %v1691_v14 = vmul.u32.u64.low %v384_v51, %v379_v55  ;;  %v1692_v11 = vmul.u32.u64.high %v384_v51, %v379_v55, %v1691_v14  ;;  %v496_v24 = vadd.s32 %v1594_v61, %v1588_v29 }
 0x11a   :  { %v1330_v62 = vpop.eup %1329  ;;  %v383_v9 = vsel %vm369_vm4, %v380_v60, %v382_v4  ;;  %vm1206_vm6 = vcmp.lt.s32.totalorder %v1205_v21, 0  ;;  %v375_v33 = vsel %vm369_vm4, %v372_v0, %v374_v58  ;;  %v222_v18 = vand.u32 3, %v221_v23 }
 0x11b   :  { %v1332_v2 = vpop.eup %1331  ;;  %v332_v3 = vxor.u32 2147483648, %v1330_v62  ;;  %v1697_v12 = vmul.u32.u64.low %v384_v51, %v383_v9  ;;  %v1698_v22 = vmul.u32.u64.high %v384_v51, %v383_v9, %v1697_v12  ;;  %v511_v27 = vsel %vm1206_vm6, 0, %v1205_v21 }
 0x11c   :  { %v329_v6 = vxor.u32 2147483648, %v1332_v2  ;;  %v512_v41 = vsub.s32 32, %v511_v27  ;;  %v516_v32 = vsub.s32 4294967266, %v511_v27  ;;  %v394_v39 = vadd.s32 1, %v1692_v11 }
 0x11d   :  { %v333_v20 = vsel %vm331_vm15, %v332_v3, %v1332_v2  ;;  %v513_v44 = vshll.u32 %v1652_v37, %v511_v27  ;;  %v391_v45 = vmul.u32 %v384_v51, %v375_v33  ;;  %vm393_vm8 = vc.u32 %v1698_v22, %v1691_v14 }
 0x11e   :  { %v330_v13 = vsel %vm328_vm13, %v1330_v62, %v329_v6  ;;  %v514_v29 = vshrl.u32 %v496_v24, %v512_v41  ;;  %v517_v61 = vadd.s32 127, %v516_v32  ;;  %v395_v47 = vsel %vm393_vm8, %v394_v39, %v1692_v11 }
 0x11f   :  { %v334_v28 = vsel %vm327_vm0, %v330_v13, %v333_v20  ;;  %v396_v7 = vadd.s32 %v395_v47, %v391_v45  ;;  %vm227_vm9 = vcmp.eq.s32.totalorder %v222_v18, 2  ;;  %vm224_vm10 = vcmp.eq.s32.totalorder %v222_v18, 0 }
 0x120   :  { %v1710_v35 = vsel %vm324_vm3, nan, %v334_v28  ;;  %v515_v46 = vor.u32 %v514_v29, %v513_v44  ;;  %v518_v30 = vshll.u32 %v517_v61, 23  ;;  %vm223_vm11 = vcmp.lt.s32.totalorder %v222_v18, 2 }
 0x121   :  { %v545_v43 = vmax.f32 %v1710_v35, 0.0  ;;  %v397_v16 = vadd.s32 536870912, %v396_v7  ;;  %vm220_vm12 = vweird.f32 %v1441_v10  ;;  %vm442_vm13 = vcmp.lt.s32.totalorder %v1447_v15, 0  ;;  %v556_v35 = vld [vmem:[%s2079_s2 + $0x18] sm:$0xff] }
 0x122   :  { %v519_v50 = vor.u32 4788187, %v518_v30  ;;  %v522_v26 = vcvt.s32.f32 %v515_v46  ;;  %v526_v58 = vsub.s32 4, %v1639_v19  ;;  %vm441_vm15 = vcmp.le.f32.partialorder %v440_v31, 0.7853982 }
 0x123   :  { %v1334_v48 = vpop.eup %1333  ;;  %v1718_v53 = vshrl.u32 %v397_v16, 30  ;;  %v392_v20 = vadd.s32 %v1691_v14, %v1698_v22  ;;  %vm532_vm4 = vweird.f32 %v1447_v15  ;;  %vm338_vm5 = vcmp.lt.s32.totalorder %v1525_v5, 0 }
 0x124   :  { %v1336_v8 = vpop.eup %1335  ;;  %v228_v52 = vxor.u32 2147483648, %v1334_v48  ;;  %v520_v37 = vand.u32 2147483647, %v519_v50  ;;  %v527_v3 = vsel %vm442_vm13, %v526_v58, %v1639_v19  ;;  %vm337_vm6 = vcmp.le.f32.partialorder %v336_v25, 0.7853982 }
 0x125   :  { %v225_v17 = vxor.u32 2147483648, %v1336_v8  ;;  %v399_v59 = vshll.u32 %v1718_v53, 30  ;;  %v529_v4 = vsel %vm441_vm15, 0, %v527_v3 }
 0x126   :  { %v229_v51 = vsel %vm227_vm9, %v228_v52, %v1336_v8  ;;  %v523_v56 = vmul.f32 %v522_v26, %v520_v37  ;;  %v533_v9 = vadd.s32 3, %v529_v4 }
 0x127   :  { %v226_v54 = vsel %vm224_vm10, %v1334_v48, %v225_v17  ;;  %v400_v63 = vsub.s32 %v396_v7, %v399_v59  ;;  %v422_v7 = vsub.s32 4, %v1718_v53 }
 0x128   :  { %v230_v57 = vsel %vm223_vm11, %v226_v54, %v229_v51  ;;  %v524_v62 = vxor.u32 2147483648, %v523_v56  ;;  %v534_v13 = vand.u32 3, %v533_v9  ;;  %vm428_vm11 = vweird.f32 %v1525_v5 }
 0x129   :  { %v1722_v60 = vsel %vm220_vm12, nan, %v230_v57  ;;  %v402_v10 = vsub.s32 0, %v400_v63 }
 0x12a   :  { %v544_v0 = vmax.f32 %v1722_v60, 0.0  ;;  %v525_v1 = vsel %vm442_vm13, %v524_v62, %v523_v56  ;;  %vm539_vm1 = vcmp.eq.s32.totalorder %v534_v13, 2  ;;  %vm536_vm2 = vcmp.eq.s32.totalorder %v534_v13, 0 }
 0x12b   :  { %v528_v2 = vsel %vm441_vm15, %v1447_v15, %v525_v1  ;;  %v1200_v21 = vmin.u32 %v402_v10, %v400_v63  ;;  %vm535_vm3 = vcmp.lt.s32.totalorder %v534_v13, 2  ;;  %v423_v15 = vsel %vm338_vm5, %v422_v7, %v1718_v53  ;;  %v554_v53 = vld [vmem:[%s2079_s2 + $0x8] sm:$0xff] }
 0x12c   :  { %1337 = vcosq.f32 %v528_v2  ;;  %v425_v8 = vsel %vm337_vm6, 0, %v423_v15 }
 0x12d   :  { %1339 = vsinq.f32 %v528_v2  ;;  %v404_v55 = vclz %v1200_v21  ;;  %v429_v52 = vadd.s32 3, %v425_v8 }
 0x12f   :  { %v1201_v6 = vadd.s32 4294967294, %v404_v55  ;;  %v430_v16 = vand.u32 3, %v429_v52 }
 0x131   :  { %vm1202_vm0 = vcmp.lt.s32.totalorder %v1201_v6, 0  ;;  %vm435_vm8 = vcmp.eq.s32.totalorder %v430_v16, 2  ;;  %vm432_vm9 = vcmp.eq.s32.totalorder %v430_v16, 0  ;;  %vm431_vm10 = vcmp.lt.s32.totalorder %v430_v16, 2 }
 0x132   :  { %v407_v11 = vsel %vm1202_vm0, 0, %v1201_v6 }
 0x133   :  { %v408_v12 = vsub.s32 32, %v407_v11  ;;  %v412_v31 = vsub.s32 4294967266, %v407_v11  ;;  %v409_v23 = vshll.u32 %v400_v63, %v407_v11 }
 0x135   :  { %v410_v24 = vshrl.u32 %v392_v20, %v408_v12  ;;  %v413_v27 = vadd.s32 127, %v412_v31 }
 0x137   :  { %v411_v41 = vor.u32 %v410_v24, %v409_v23  ;;  %v414_v19 = vshll.u32 %v413_v27, 23 }
 0x139   :  { %v1338_v28 = vpop.eup %1337  ;;  %v415_v44 = vor.u32 4788187, %v414_v19  ;;  %v418_v14 = vcvt.s32.f32 %v411_v41 }
 0x13a   :  { %v1340_v32 = vpop.eup %1339  ;;  %v540_v33 = vxor.u32 2147483648, %v1338_v28 }
 0x13b   :  { %v537_v39 = vxor.u32 2147483648, %v1340_v32  ;;  %v416_v45 = vand.u32 2147483647, %v415_v44 }
 0x13c   :  { %v541_v29 = vsel %vm539_vm1, %v540_v33, %v1340_v32 }
 0x13d   :  { %v538_v61 = vsel %vm536_vm2, %v1338_v28, %v537_v39  ;;  %v419_v46 = vmul.f32 %v418_v14, %v416_v45 }
 0x13e   :  { %v542_v22 = vsel %vm535_vm3, %v538_v61, %v541_v29 }
 0x13f   :  { %v543_v18 = vsel %vm532_vm4, nan, %v542_v22  ;;  %v420_v47 = vxor.u32 2147483648, %v419_v46 }
 0x140   :  { %v547_v30 = vmax.f32 %v543_v18, 0.0 }
 0x141   :  { %v421_v48 = vsel %vm338_vm5, %v420_v47, %v419_v46 }
 0x142   :  { %1260 = vmatprep.subr.mxu1 %v547_v30  ;;  %v424_v50 = vsel %vm337_vm6, %v1525_v5, %v421_v48  ;;  %v555_v5 = vld [vmem:[%s2079_s2 + $0x10] sm:$0xff] }
 0x143   :  { %1261 = vmatpush3.msra.mxu1 %v547_v30  ;;  %1341 = vcosq.f32 %v424_v50 }
 0x144   :  { %1343 = vsinq.f32 %v424_v50 }
 0x150   :  { %v1342_v17 = vpop.eup %1341 }
 0x151   :  { %v1344_v37 = vpop.eup %1343  ;;  %v436_v26 = vxor.u32 2147483648, %v1342_v17 }
 0x152   :  { %v433_v51 = vxor.u32 2147483648, %v1344_v37 }
 0x153   :  { %v437_v54 = vsel %vm435_vm8, %v436_v26, %v1344_v37 }
 0x154   :  { %v434_v25 = vsel %vm432_vm9, %v1342_v17, %v433_v51 }
 0x155   :  { %v438_v56 = vsel %vm431_vm10, %v434_v25, %v437_v54 }
 0x156   :  { %v439_v57 = vsel %vm428_vm11, nan, %v438_v56 }
 0x157   :  { %v546_v59 = vmax.f32 %v439_v57, 0.0 }
 0x159   :  { %1262 = vmatprep.subr.mxu1 %v546_v59 }
 0x15a   :  { %1263 = vmatpush3.msra.mxu1 %v546_v59 }
 0x15b   :  { %1264 = vmatprep.subr.mxu1 %v545_v43 }
 0x15c   :  { %1265 = vmatpush3.msra.mxu1 %v545_v43 }
 0x15d   :  { %1266 = vmatprep.subr.mxu1 %v544_v0 }
 0x15e   :  { %1267 = vmatpush3.msra.mxu1 %v544_v0 }
 0x15f   :  { %1269 = vmatmul.mubr.msk.f32.vlgmr.msra.gmra.mxu1 %vm562_vm7, %v554_v53 }
 0x160   :  { %1271 = vmatprep.mubr.msk.f32.mxu1 %vm562_vm7, %v555_v5 }
 0x163   :  { %1272 = vmatmul.mubr.msk.f32.gmra.mxu1 %vm562_vm7, %v556_v35 }
 0x21f   :  { %v1761_v43 = vpop.f32.mrf.mxu1 }
 0x220   :  { %v768_v62 = vand.u32 2147483647, %v1761_v43  ;;  %v771_v58 = vand.u32 2139095040, %v1761_v43 }
 0x221   :  { %v1765_v63 = vpop.f32.mrf.mxu1 }
 0x222   :  { %v772_v60 = vshrl.u32 %v771_v58, 23  ;;  %v775_v0 = vand.u32 8388607, %v768_v62  ;;  %v664_v1 = vand.u32 2147483647, %v1765_v63  ;;  %v667_v2 = vand.u32 2139095040, %v1765_v63 }
 0x223   :  { %v1771_v10 = vpop.f32.mrf.mxu1 }
 0x224   :  { %v1216_v3 = vadd.s32 4294967169, %v772_v60  ;;  %v668_v21 = vshrl.u32 %v667_v2, 23  ;;  %v671_v55 = vand.u32 8388607, %v664_v1  ;;  %v979_v4 = vand.u32 2139095040, %v1771_v10 }
 0x225   :  { %v776_v9 = vor.u32 8388608, %v775_v0  ;;  %v976_v41 = vand.u32 2147483647, %v1771_v10 }
 0x226   :  { %v778_v6 = vadd.s32 1, %v1216_v3  ;;  %v1212_v11 = vadd.s32 4294967169, %v668_v21  ;;  %v672_v20 = vor.u32 8388608, %v671_v55  ;;  %v980_v12 = vshrl.u32 %v979_v4, 23 }
 0x227   :  { %v1776_v27 = vshll.u32 %v776_v9, 8 }
 0x228   :  { %vm779_vm12 = vcmp.gt.s32.totalorder %v778_v6, 0  ;;  %v674_v13 = vadd.s32 1, %v1212_v11  ;;  %v1778_v28 = vshll.u32 %v672_v20, 8  ;;  %v1224_v19 = vadd.s32 4294967169, %v980_v12 }
 0x229   :  { %v780_v31 = vsel %vm779_vm12, %v778_v6, 0 }
 0x22a   :  { %v781_v23 = vshrl.u32 %v780_v31, 5  ;;  %v782_v24 = vand.u32 31, %v780_v31  ;;  %vm675_vm13 = vcmp.gt.s32.totalorder %v674_v13, 0  ;;  %v986_v5 = vadd.s32 1, %v1224_v19 }
 0x22b   :  { %v676_v50 = vsel %vm675_vm13, %v674_v13, 0 }
 0x22c   :  { %v783_v32 = vsub.s32 32, %v782_v24  ;;  %v785_v33 = vshll.u32 %v1384_v34, %v782_v24  ;;  %v788_v39 = vshll.u32 %v1385_v36, %v782_v24  ;;  %v791_v44 = vshll.u32 %v1386_v38, %v782_v24 }
 0x22d   :  { %v794_v29 = vshll.u32 %v1387_v40, %v782_v24  ;;  %v797_v61 = vshll.u32 %v1388_v42, %v782_v24  ;;  %vm800_vm15 = vcmp.lt.s32.totalorder %v781_v23, 1  ;;  %vm801_vm0 = vcmp.lt.s32.totalorder %v781_v23, 2 }
 0x22e   :  { %v786_v45 = vshrl.u32 %v1385_v36, %v783_v32  ;;  %v789_v14 = vshrl.u32 %v1386_v38, %v783_v32  ;;  %v792_v22 = vshrl.u32 %v1387_v40, %v783_v32  ;;  %v784_v18 = vshrl.u32 %v1384_v34, %v783_v32 }
 0x22f   :  { %v795_v46 = vshrl.u32 %v1388_v42, %v783_v32  ;;  %v798_v30 = vshrl.u32 %v1389_v49, %v783_v32  ;;  %vm802_vm1 = vcmp.lt.s32.totalorder %v781_v23, 3  ;;  %vm803_vm2 = vcmp.lt.s32.totalorder %v781_v23, 4 }
 0x230   :  { %v787_v47 = vor.u32 %v786_v45, %v785_v33  ;;  %v790_v7 = vor.u32 %v789_v14, %v788_v39  ;;  %v793_v48 = vor.u32 %v792_v22, %v791_v44  ;;  %v678_v52 = vand.u32 31, %v676_v50 }
 0x231   :  { %v796_v15 = vor.u32 %v795_v46, %v794_v29  ;;  %v799_v8 = vor.u32 %v798_v30, %v797_v61  ;;  %v677_v60 = vshrl.u32 %v676_v50, 5  ;;  %vm987_vm9 = vcmp.gt.s32.totalorder %v986_v5, 0 }
 0x232   :  { %v804_v16 = vsel %vm800_vm15, %v784_v18, %v787_v47  ;;  %v805_v17 = vsel %vm803_vm2, %v793_v48, 2102212464  ;;  %v808_v37 = vsel %vm800_vm15, %v787_v47, %v790_v7  ;;  %v812_v26 = vsel %vm800_vm15, %v790_v7, %v793_v48 }
 0x233   :  { %v806_v51 = vsel %vm802_vm1, %v790_v7, %v805_v17  ;;  %v809_v54 = vsel %vm803_vm2, %v796_v15, 920167782  ;;  %v813_v25 = vsel %vm803_vm2, %v799_v8, 1326507024  ;;  %v679_v56 = vsub.s32 32, %v678_v52 }
 0x234   :  { %v807_v57 = vsel %vm801_vm0, %v804_v16, %v806_v51  ;;  %v810_v59 = vsel %vm802_vm1, %v793_v48, %v809_v54  ;;  %v814_v53 = vsel %vm802_vm1, %v796_v15, %v813_v25  ;;  %v681_v0 = vshll.u32 %v1384_v34, %v678_v52 }
 0x235   :  { %v811_v35 = vsel %vm801_vm0, %v808_v37, %v810_v59  ;;  %v815_v58 = vsel %vm801_vm0, %v812_v26, %v814_v53  ;;  %v823_v4 = vmul.u32 %v1776_v27, %v807_v57  ;;  %v682_v6 = vshrl.u32 %v1385_v36, %v679_v56  ;;  %v1094_v59 = vld [vmem:[#allocation4 + $0x10] sm:$0x1] }
 0x236   :  { %v1804_v2 = vmul.u32.u64.low %v1776_v27, %v815_v58  ;;  %v1805_v3 = vmul.u32.u64.high %v1776_v27, %v815_v58, %v1804_v2  ;;  %v1808_v21 = vmul.u32.u64.low %v1776_v27, %v811_v35  ;;  %v1809_v55 = vmul.u32.u64.high %v1776_v27, %v811_v35, %v1808_v21 }
 0x237   :  { %v684_v9 = vshll.u32 %v1385_v36, %v678_v52  ;;  %v685_v11 = vshrl.u32 %v1386_v38, %v679_v56  ;;  %v687_v20 = vshll.u32 %v1386_v38, %v678_v52  ;;  %v688_v12 = vshrl.u32 %v1387_v40, %v679_v56 }
 0x238   :  { %v690_v31 = vshll.u32 %v1387_v40, %v678_v52  ;;  %v691_v13 = vshrl.u32 %v1388_v42, %v679_v56  ;;  %v683_v23 = vor.u32 %v682_v6, %v681_v0  ;;  %v693_v19 = vshll.u32 %v1388_v42, %v678_v52 }
 0x239   :  { %v686_v24 = vor.u32 %v685_v11, %v684_v9  ;;  %v694_v27 = vshrl.u32 %v1389_v49, %v679_v56  ;;  %vm825_vm3 = vc.u32 %v1805_v3, %v1808_v21  ;;  %v826_v32 = vadd.s32 1, %v1809_v55 }
 0x23a   :  { %v680_v33 = vshrl.u32 %v1384_v34, %v679_v56  ;;  %v689_v39 = vor.u32 %v688_v12, %v687_v20  ;;  %v692_v44 = vor.u32 %v691_v13, %v690_v31  ;;  %vm696_vm4 = vcmp.lt.s32.totalorder %v677_v60, 1 }
 0x23b   :  { %v695_v29 = vor.u32 %v694_v27, %v693_v19  ;;  %vm697_vm5 = vcmp.lt.s32.totalorder %v677_v60, 2  ;;  %v827_v61 = vsel %vm825_vm3, %v826_v32, %v1809_v55  ;;  %vm698_vm6 = vcmp.lt.s32.totalorder %v677_v60, 3 }
 0x23c   :  { %vm699_vm8 = vcmp.lt.s32.totalorder %v677_v60, 4  ;;  %v704_v45 = vsel %vm696_vm4, %v683_v23, %v686_v24  ;;  %v828_v14 = vadd.s32 %v827_v61, %v823_v4  ;;  %v708_v46 = vsel %vm696_vm4, %v686_v24, %v689_v39 }
 0x23d   :  { %v701_v22 = vsel %vm699_vm8, %v689_v39, 2102212464  ;;  %v705_v18 = vsel %vm699_vm8, %v692_v44, 920167782  ;;  %v700_v30 = vsel %vm696_vm4, %v680_v33, %v683_v23  ;;  %v709_v7 = vsel %vm699_vm8, %v695_v29, 1326507024 }
 0x23e   :  { %v706_v47 = vsel %vm698_vm6, %v689_v39, %v705_v18  ;;  %v829_v48 = vadd.s32 536870912, %v828_v14  ;;  %v702_v50 = vsel %vm698_vm6, %v686_v24, %v701_v22  ;;  %v710_v8 = vsel %vm698_vm6, %v692_v44, %v709_v7 }
 0x23f   :  { %v707_v15 = vsel %vm697_vm5, %v704_v45, %v706_v47  ;;  %v711_v52 = vsel %vm697_vm5, %v708_v46, %v710_v8  ;;  %v983_v37 = vand.u32 8388607, %v976_v41  ;;  %v988_v25 = vsel %vm987_vm9, %v986_v5, 0  ;;  %v1849_v5 = vpop.f32.mrf.mxu1 }
 0x240   :  { %v1830_v16 = vmul.u32.u64.low %v1778_v28, %v707_v15  ;;  %v1831_v17 = vmul.u32.u64.high %v1778_v28, %v707_v15, %v1830_v16  ;;  %v1836_v26 = vshrl.u32 %v829_v48, 30  ;;  %v703_v56 = vsel %vm697_vm5, %v700_v30, %v702_v50 }
 0x241   :  { %v1839_v51 = vmul.u32.u64.low %v1778_v28, %v711_v52  ;;  %v1840_v54 = vmul.u32.u64.high %v1778_v28, %v711_v52, %v1839_v51  ;;  %v990_v57 = vand.u32 31, %v988_v25  ;;  %v984_v58 = vor.u32 8388608, %v983_v37 }
 0x242   :  { %v831_v53 = vshll.u32 %v1836_v26, 30  ;;  %v722_v35 = vadd.s32 1, %v1831_v17  ;;  %v1390_v0 = vmov 0.0   ;;  %v719_v55 = vmul.u32 %v1778_v28, %v703_v56 }
 0x243   :  { %1274 = vmatprep.subr.mxu0 %v1390_v0  ;;  %vm721_vm10 = vc.u32 %v1840_v54, %v1830_v16  ;;  %v991_v4 = vsub.s32 32, %v990_v57  ;;  %v1854_v11 = vshll.u32 %v984_v58, 8  ;;  %v875_v20 = vand.u32 2139095040, %v1849_v5 }
 0x244   :  { %v832_v2 = vsub.s32 %v828_v14, %v831_v53  ;;  %1275 = vmatpush3.msk.msra.mxu0 %vm575_vm14, %v1094_v59  ;;  %v723_v60 = vsel %vm721_vm10, %v722_v35, %v1831_v17  ;;  %v1859_v23 = vshrl.u32 %v988_v25, 5  ;;  %v1002_v19 = vshll.u32 %v1387_v40, %v990_v57 }
 0x245   :  { %1276 = vmatprep.subr.mxu0 %v1390_v0  ;;  %v724_v9 = vadd.s32 %v723_v60, %v719_v55  ;;  %v994_v31 = vshrl.u32 %v1385_v36, %v991_v4  ;;  %v997_v13 = vshrl.u32 %v1386_v38, %v991_v4  ;;  %v1000_v24 = vshrl.u32 %v1387_v40, %v991_v4 }
 0x246   :  { %v834_v6 = vsub.s32 0, %v832_v2  ;;  %v1003_v27 = vshrl.u32 %v1388_v42, %v991_v4  ;;  %v993_v33 = vshll.u32 %v1384_v34, %v990_v57  ;;  %v996_v39 = vshll.u32 %v1385_v36, %v990_v57 }
 0x247   :  { %v725_v28 = vadd.s32 536870912, %v724_v9  ;;  %v1006_v44 = vshrl.u32 %v1389_v49, %v991_v4  ;;  %v824_v29 = vadd.s32 %v1808_v21, %v1805_v3  ;;  %v999_v45 = vshll.u32 %v1386_v38, %v990_v57 }
 0x248   :  { %v1217_v12 = vmin.u32 %v834_v6, %v832_v2  ;;  %v1004_v14 = vor.u32 %v1003_v27, %v1002_v19  ;;  %vm770_vm14 = vcmp.lt.s32.totalorder %v1761_v43, 0  ;;  %v995_v18 = vor.u32 %v994_v31, %v993_v33 }
 0x249   :  { %v1869_v61 = vshrl.u32 %v725_v28, 30  ;;  %v998_v46 = vor.u32 %v997_v13, %v996_v39  ;;  %v1005_v30 = vshll.u32 %v1388_v42, %v990_v57  ;;  %v1001_v7 = vor.u32 %v1000_v24, %v999_v45 }
 0x24a   :  { %v836_v32 = vclz %v1217_v12  ;;  %vm1011_vm11 = vcmp.lt.s32.totalorder %v1859_v23, 4  ;;  %v876_v48 = vshrl.u32 %v875_v20, 23  ;;  %v854_v3 = vsub.s32 4, %v1836_v26 }
 0x24b   :  { %v727_v47 = vshll.u32 %v1869_v61, 30  ;;  %v1007_v21 = vor.u32 %v1006_v44, %v1005_v30  ;;  %v1017_v50 = vsel %vm1011_vm11, %v1004_v14, 920167782  ;;  %v992_v52 = vshrl.u32 %v1384_v34, %v991_v4 }
 0x24c   :  { %v1218_v22 = vadd.s32 4294967294, %v836_v32  ;;  %vm1008_vm13 = vcmp.lt.s32.totalorder %v1859_v23, 1  ;;  %vm1010_vm15 = vcmp.lt.s32.totalorder %v1859_v23, 3  ;;  %vm1009_vm0 = vcmp.lt.s32.totalorder %v1859_v23, 2 }
 0x24d   :  { %v1879_v8 = vsub.s32 %v724_v9, %v727_v47  ;;  %v1016_v51 = vsel %vm1008_vm13, %v995_v18, %v998_v46  ;;  %v1018_v56 = vsel %vm1010_vm15, %v1001_v7, %v1017_v50  ;;  %v1020_v57 = vsel %vm1008_vm13, %v998_v46, %v1001_v7 }
 0x24e   :  { %vm1219_vm12 = vcmp.lt.s32.totalorder %v1218_v22, 0  ;;  %v1021_v58 = vsel %vm1011_vm11, %v1007_v21, 1326507024  ;;  %v1013_v4 = vsel %vm1011_vm11, %v1001_v7, 2102212464  ;;  %v1019_v60 = vsel %vm1009_vm0, %v1016_v51, %v1018_v56 }
 0x24f   :  { %v839_v15 = vsel %vm1219_vm12, 0, %v1218_v22  ;;  %v730_v25 = vsub.s32 0, %v1879_v8  ;;  %v1022_v6 = vsel %vm1010_vm15, %v1004_v14, %v1021_v58  ;;  %v1220_v12 = vadd.s32 4294967169, %v876_v48 }
 0x250   :  { %v840_v17 = vsub.s32 32, %v839_v15  ;;  %v844_v37 = vsub.s32 4294967266, %v839_v15  ;;  %v841_v59 = vshll.u32 %v832_v2, %v839_v15  ;;  %v1023_v2 = vsel %vm1009_vm0, %v1020_v57, %v1022_v6 }
 0x251   :  { %v1213_v55 = vmin.u32 %v730_v25, %v1879_v8  ;;  %v855_v28 = vsel %vm770_vm14, %v854_v3, %v1836_v26  ;;  %v1012_v13 = vsel %vm1008_vm13, %v992_v52, %v995_v18  ;;  %v872_v24 = vand.u32 2147483647, %v1849_v5 }
 0x252   :  { %v842_v53 = vshrl.u32 %v824_v29, %v840_v17  ;;  %v845_v35 = vadd.s32 127, %v844_v37  ;;  %v1014_v27 = vsel %vm1010_vm15, %v998_v46, %v1013_v4  ;;  %v882_v26 = vadd.s32 1, %v1220_v12 }
 0x253   :  { %v732_v31 = vclz %v1213_v55  ;;  %v1912_v32 = vmul.u32.u64.low %v1854_v11, %v1023_v2  ;;  %v1913_v33 = vmul.u32.u64.high %v1854_v11, %v1023_v2, %v1912_v32  ;;  %vm1922_vm1 = vcmp.le.f32.partialorder %v768_v62, 0.7853982 }
 0x254   :  { %v843_v9 = vor.u32 %v842_v53, %v841_v59  ;;  %v846_v20 = vshll.u32 %v845_v35, 23  ;;  %v1916_v44 = vmul.u32.u64.low %v1854_v11, %v1019_v60  ;;  %v1917_v29 = vmul.u32.u64.high %v1854_v11, %v1019_v60, %v1916_v44 }
 0x255   :  { %v1214_v39 = vadd.s32 4294967294, %v732_v31  ;;  %v857_v18 = vsel %vm1922_vm1, 0, %v855_v28  ;;  %v1015_v46 = vsel %vm1009_vm0, %v1012_v13, %v1014_v27  ;;  %vm883_vm3 = vcmp.gt.s32.totalorder %v882_v26, 0 }
 0x256   :  { %v847_v19 = vor.u32 4788187, %v846_v20  ;;  %v850_v22 = vcvt.s32.f32 %v843_v9  ;;  %vm1391_vm4 = vmmov 0   ;;  %vm1033_vm5 = vc.u32 %v1913_v33, %v1916_v44 }
 0x257   :  { %vm1215_vm2 = vcmp.lt.s32.totalorder %v1214_v39, 0  ;;  %1284 = vmatprep.mubr.msk.f32.mxu0 %vm1391_vm4, %v1390_v0  ;;  %v879_v62 = vand.u32 8388607, %v872_v24  ;;  %v720_v7 = vadd.s32 %v1830_v16, %v1840_v54  ;;  %v1034_v23 = vadd.s32 1, %v1917_v29 }
 0x258   :  { %v848_v14 = vand.u32 2147483647, %v847_v19  ;;  %v735_v47 = vsel %vm1215_vm2, 0, %v1214_v39  ;;  %v861_v50 = vadd.s32 3, %v857_v18  ;;  %v1031_v15 = vmul.u32 %v1854_v11, %v1015_v46 }
 0x259   :  { %v736_v48 = vsub.s32 32, %v735_v47  ;;  %v740_v3 = vsub.s32 4294967266, %v735_v47  ;;  %v884_v52 = vsel %vm883_vm3, %v882_v26, 0  ;;  %v737_v17 = vshll.u32 %v1879_v8, %v735_v47 }
 0x25a   :  { %v851_v30 = vmul.f32 %v850_v22, %v848_v14  ;;  %v1035_v25 = vsel %vm1033_vm5, %v1034_v23, %v1917_v29  ;;  %v750_v16 = vsub.s32 4, %v1869_v61  ;;  %v886_v57 = vand.u32 31, %v884_v52 }
 0x25b   :  { %v738_v37 = vshrl.u32 %v720_v7, %v736_v48  ;;  %v741_v51 = vadd.s32 127, %v740_v3  ;;  %v1036_v54 = vadd.s32 %v1035_v25, %v1031_v15  ;;  %vm666_vm6 = vcmp.lt.s32.totalorder %v1765_v63, 0 }
 0x25c   :  { %v852_v21 = vxor.u32 2147483648, %v851_v30  ;;  %v887_v35 = vsub.s32 32, %v886_v57  ;;  %vm1950_vm8 = vcmp.le.f32.partialorder %v664_v1, 0.7853982  ;;  %v880_v4 = vor.u32 8388608, %v879_v62 }
 0x25d   :  { %v739_v53 = vor.u32 %v738_v37, %v737_v17  ;;  %v742_v11 = vshll.u32 %v741_v51, 23  ;;  %v1037_v8 = vadd.s32 536870912, %v1036_v54  ;;  %v1954_v60 = vand.u32 3, %v861_v50 }
 0x25e   :  { %v853_v56 = vsel %vm770_vm14, %v852_v21, %v851_v30  ;;  %v1959_v6 = vsel %vm666_vm6, %v750_v16, %v1869_v61  ;;  %v890_v20 = vshrl.u32 %v1385_v36, %v887_v35  ;;  %v893_v1 = vshrl.u32 %v1386_v38, %v887_v35 }
 0x25f   :  { %v856_v59 = vsel %vm1922_vm1, %v1761_v43, %v853_v56  ;;  %v743_v55 = vor.u32 4788187, %v742_v11  ;;  %v1961_v9 = vshrl.u32 %v1037_v8, 30  ;;  %v746_v12 = vcvt.s32.f32 %v739_v53 }
 0x260   :  { %1345 = vcosq.f32 %v856_v59  ;;  %v896_v28 = vshrl.u32 %v1387_v40, %v887_v35  ;;  %v1967_v13 = vshrl.u32 %v884_v52, 5  ;;  %v889_v19 = vshll.u32 %v1384_v34, %v886_v57 }
 0x261   :  { %1347 = vsinq.f32 %v856_v59  ;;  %v744_v2 = vand.u32 2147483647, %v743_v55  ;;  %v1039_v31 = vshll.u32 %v1961_v9, 30  ;;  %v895_v27 = vshll.u32 %v1386_v38, %v886_v57 }
 0x262   :  { %v892_v32 = vshll.u32 %v1385_v36, %v886_v57  ;;  %v898_v39 = vshll.u32 %v1387_v40, %v886_v57  ;;  %v899_v29 = vshrl.u32 %v1388_v42, %v887_v35  ;;  %v891_v45 = vor.u32 %v890_v20, %v889_v19 }
 0x263   :  { %v747_v61 = vmul.f32 %v746_v12, %v744_v2  ;;  %v1974_v26 = vsub.s32 %v1036_v54, %v1039_v31  ;;  %v897_v14 = vor.u32 %v896_v28, %v895_v27  ;;  %v902_v22 = vshrl.u32 %v1389_v49, %v887_v35 }
 0x264   :  { %v894_v46 = vor.u32 %v893_v1, %v892_v32  ;;  %v900_v30 = vor.u32 %v899_v29, %v898_v39  ;;  %v901_v47 = vshll.u32 %v1388_v42, %v886_v57  ;;  %vm864_vm9 = vcmp.eq.s32.totalorder %v1954_v60, 0 }
 0x265   :  { %v748_v18 = vxor.u32 2147483648, %v747_v61  ;;  %vm867_vm10 = vcmp.eq.s32.totalorder %v1954_v60, 2  ;;  %v753_v36 = vsel %vm1950_vm8, 0, %v1959_v6  ;;  %v1042_v38 = vsub.s32 0, %v1974_v26 }
 0x266   :  { %v920_v40 = vshll.u32 %v880_v4, 8  ;;  %vm863_vm14 = vcmp.lt.s32.totalorder %v1954_v60, 2  ;;  %v903_v62 = vor.u32 %v902_v22, %v901_v47  ;;  %vm904_vm11 = vcmp.lt.s32.totalorder %v1967_v13, 1 }
 0x267   :  { %v749_v49 = vsel %vm666_vm6, %v748_v18, %v747_v61  ;;  %vm907_vm12 = vcmp.lt.s32.totalorder %v1967_v13, 4  ;;  %vm860_vm13 = vweird.f32 %v1761_v43  ;;  %v1225_v7 = vmin.u32 %v1042_v38, %v1974_v26 }
 0x268   :  { %v752_v42 = vsel %vm1950_vm8, %v1765_v63, %v749_v49  ;;  %v888_v48 = vshrl.u32 %v1384_v34, %v887_v35  ;;  %v909_v3 = vsel %vm907_vm12, %v897_v14, 2102212464  ;;  %vm905_vm15 = vcmp.lt.s32.totalorder %v1967_v13, 2 }
 0x269   :  { %1349 = vcosq.f32 %v752_v42  ;;  %v912_v23 = vsel %vm904_vm11, %v891_v45, %v894_v46  ;;  %v913_v21 = vsel %vm907_vm12, %v900_v30, 920167782  ;;  %v1044_v50 = vclz %v1225_v7 }
 0x26a   :  { %1351 = vsinq.f32 %v752_v42  ;;  %vm906_vm0 = vcmp.lt.s32.totalorder %v1967_v13, 3  ;;  %v916_v15 = vsel %vm904_vm11, %v894_v46, %v897_v14  ;;  %v908_v52 = vsel %vm904_vm11, %v888_v48, %v891_v45 }
 0x26b   :  { %v910_v17 = vsel %vm906_vm0, %v894_v46, %v909_v3  ;;  %v914_v37 = vsel %vm906_vm0, %v897_v14, %v913_v21  ;;  %v917_v51 = vsel %vm907_vm12, %v903_v62, 1326507024  ;;  %v1226_v16 = vadd.s32 4294967294, %v1044_v50 }
 0x26c   :  { %v915_v54 = vsel %vm905_vm15, %v912_v23, %v914_v37  ;;  %v918_v57 = vsel %vm906_vm0, %v900_v30, %v917_v51  ;;  %v757_v6 = vadd.s32 3, %v753_v36  ;;  %v1032_v20 = vadd.s32 %v1916_v44, %v1913_v33 }
 0x26d   :  { %v1346_v34 = vpop.eup %1345  ;;  %v919_v53 = vsel %vm905_vm15, %v916_v15, %v918_v57  ;;  %v2013_v11 = vmul.u32.u64.low %v920_v40, %v915_v54  ;;  %v2014_v8 = vmul.u32.u64.high %v920_v40, %v915_v54, %v2013_v11  ;;  %vm1227_vm1 = vcmp.lt.s32.totalorder %v1226_v16, 0 }
 0x26e   :  { %v1348_v25 = vpop.eup %1347  ;;  %v868_v56 = vxor.u32 2147483648, %v1346_v34  ;;  %v2019_v58 = vmul.u32.u64.low %v920_v40, %v919_v53  ;;  %v2020_v55 = vmul.u32.u64.high %v920_v40, %v919_v53, %v2019_v58  ;;  %v1047_v2 = vsel %vm1227_vm1, 0, %v1226_v16 }
 0x26f   :  { %v865_v59 = vxor.u32 2147483648, %v1348_v25  ;;  %v1048_v1 = vsub.s32 32, %v1047_v2  ;;  %v1052_v28 = vsub.s32 4294967266, %v1047_v2  ;;  %v911_v31 = vsel %vm905_vm15, %v908_v52, %v910_v17 }
 0x270   :  { %v869_v35 = vsel %vm867_vm10, %v868_v56, %v1348_v25  ;;  %v930_v27 = vadd.s32 1, %v2014_v8  ;;  %v1049_v32 = vshll.u32 %v1974_v26, %v1047_v2  ;;  %v927_v39 = vmul.u32 %v920_v40, %v911_v31 }
 0x271   :  { %v866_v4 = vsel %vm864_vm9, %v1346_v34, %v865_v59  ;;  %v1050_v33 = vshrl.u32 %v1032_v20, %v1048_v1  ;;  %v1053_v44 = vadd.s32 127, %v1052_v28  ;;  %vm929_vm2 = vc.u32 %v2020_v55, %v2013_v11 }
 0x272   :  { %v870_v12 = vsel %vm863_vm14, %v866_v4, %v869_v35  ;;  %v758_v60 = vand.u32 3, %v757_v6  ;;  %v931_v45 = vsel %vm929_vm2, %v930_v27, %v2014_v8  ;;  %vm756_vm6 = vweird.f32 %v1765_v63 }
 0x273   :  { %v2032_v19 = vsel %vm860_vm13, nan, %v870_v12  ;;  %v1051_v29 = vor.u32 %v1050_v33, %v1049_v32  ;;  %v1054_v13 = vshll.u32 %v1053_v44, 23  ;;  %v932_v43 = vadd.s32 %v931_v45, %v927_v39 }
 0x274   :  { %v1081_v61 = vmax.f32 %v2032_v19, 0.0  ;;  %vm763_vm3 = vcmp.eq.s32.totalorder %v758_v60, 2  ;;  %vm760_vm4 = vcmp.eq.s32.totalorder %v758_v60, 0  ;;  %vm759_vm5 = vcmp.lt.s32.totalorder %v758_v60, 2 }
 0x275   :  { %v1055_v22 = vor.u32 4788187, %v1054_v13  ;;  %v933_v30 = vadd.s32 536870912, %v932_v43  ;;  %v1058_v36 = vcvt.s32.f32 %v1051_v29  ;;  %vm978_vm8 = vcmp.lt.s32.totalorder %v1771_v10, 0 }
 0x276   :  { %v1350_v14 = vpop.eup %1349  ;;  %v1062_v21 = vsub.s32 4, %v1961_v9  ;;  %vm977_vm9 = vcmp.le.f32.partialorder %v976_v41, 0.7853982  ;;  %v928_v54 = vadd.s32 %v2013_v11, %v2020_v55  ;;  %vm1068_vm13 = vweird.f32 %v1771_v10 }
 0x277   :  { %v1352_v18 = vpop.eup %1351  ;;  %v764_v46 = vxor.u32 2147483648, %v1350_v14  ;;  %v1056_v26 = vand.u32 2147483647, %v1055_v22  ;;  %v2040_v40 = vshrl.u32 %v933_v30, 30  ;;  %vm874_vm15 = vcmp.lt.s32.totalorder %v1849_v5, 0 }
 0x278   :  { %v761_v47 = vxor.u32 2147483648, %v1352_v18  ;;  %v1063_v52 = vsel %vm978_vm8, %v1062_v21, %v1961_v9  ;;  %vm873_vm0 = vcmp.le.f32.partialorder %v872_v24, 0.7853982 }
 0x279   :  { %v765_v38 = vsel %vm763_vm3, %v764_v46, %v1352_v18  ;;  %v1059_v62 = vmul.f32 %v1058_v36, %v1056_v26  ;;  %v935_v7 = vshll.u32 %v2040_v40, 30  ;;  %v1065_v51 = vsel %vm977_vm9, 0, %v1063_v52 }
 0x27a   :  { %v762_v49 = vsel %vm760_vm4, %v1350_v14, %v761_v47  ;;  %v1069_v56 = vadd.s32 3, %v1065_v51  ;;  %v958_v39 = vsub.s32 4, %v2040_v40  ;;  %vm964_vm4 = vweird.f32 %v1849_v5 }
 0x27b   :  { %v766_v42 = vsel %vm759_vm5, %v762_v49, %v765_v38  ;;  %v1060_v3 = vxor.u32 2147483648, %v1059_v62  ;;  %v936_v50 = vsub.s32 %v932_v43, %v935_v7  ;;  %v1089_v38 = vld [vmem:[%s2080_s3] sm:$0x7] }
 0x27c   :  { %v2044_v48 = vsel %vm756_vm6, nan, %v766_v42  ;;  %v1070_v59 = vand.u32 3, %v1069_v56 }
 0x27d   :  { %v1080_v23 = vmax.f32 %v2044_v48, 0.0  ;;  %v1061_v15 = vsel %vm978_vm8, %v1060_v3, %v1059_v62  ;;  %v938_v63 = vsub.s32 0, %v936_v50 }
 0x27e   :  { %v1064_v34 = vsel %vm977_vm9, %v1771_v10, %v1061_v15  ;;  %vm1075_vm14 = vcmp.eq.s32.totalorder %v1070_v59, 2  ;;  %vm1072_vm11 = vcmp.eq.s32.totalorder %v1070_v59, 0  ;;  %vm1071_vm12 = vcmp.lt.s32.totalorder %v1070_v59, 2 }
 0x27f   :  { %1353 = vcosq.f32 %v1064_v34  ;;  %v1221_v17 = vmin.u32 %v938_v63, %v936_v50  ;;  %v959_v10 = vsel %vm874_vm15, %v958_v39, %v2040_v40 }
 0x280   :  { %1355 = vsinq.f32 %v1064_v34  ;;  %v961_v13 = vsel %vm873_vm0, 0, %v959_v10 }
 0x281   :  { %v940_v37 = vclz %v1221_v17  ;;  %v965_v45 = vadd.s32 3, %v961_v13 }
 0x283   :  { %v1222_v25 = vadd.s32 4294967294, %v940_v37  ;;  %v966_v43 = vand.u32 3, %v965_v45 }
 0x285   :  { %vm1223_vm10 = vcmp.lt.s32.totalorder %v1222_v25, 0  ;;  %vm971_vm1 = vcmp.eq.s32.totalorder %v966_v43, 2  ;;  %vm968_vm2 = vcmp.eq.s32.totalorder %v966_v43, 0  ;;  %vm967_vm3 = vcmp.lt.s32.totalorder %v966_v43, 2 }
 0x286   :  { %v943_v16 = vsel %vm1223_vm10, 0, %v1222_v25 }
 0x287   :  { %v944_v57 = vsub.s32 32, %v943_v16  ;;  %v948_v41 = vsub.s32 4294967266, %v943_v16  ;;  %v945_v53 = vshll.u32 %v936_v50, %v943_v16 }
 0x289   :  { %v946_v8 = vshrl.u32 %v928_v54, %v944_v57  ;;  %v949_v35 = vadd.s32 127, %v948_v41 }
 0x28b   :  { %v947_v4 = vor.u32 %v946_v8, %v945_v53  ;;  %v950_v9 = vshll.u32 %v949_v35, 23 }
 0x28c   :  { %v1354_v58 = vpop.eup %1353 }
 0x28d   :  { %v1356_v6 = vpop.eup %1355  ;;  %v1076_v20 = vxor.u32 2147483648, %v1354_v58  ;;  %v951_v12 = vor.u32 4788187, %v950_v9  ;;  %v954_v11 = vcvt.s32.f32 %v947_v4 }
 0x28e   :  { %v1073_v2 = vxor.u32 2147483648, %v1356_v6 }
 0x28f   :  { %v1077_v1 = vsel %vm1075_vm14, %v1076_v20, %v1356_v6  ;;  %v952_v31 = vand.u32 2147483647, %v951_v12 }
 0x290   :  { %v1074_v28 = vsel %vm1072_vm11, %v1354_v58, %v1073_v2 }
 0x291   :  { %v1078_v55 = vsel %vm1071_vm12, %v1074_v28, %v1077_v1  ;;  %v955_v32 = vmul.f32 %v954_v11, %v952_v31 }
 0x292   :  { %v1079_v27 = vsel %vm1068_vm13, nan, %v1078_v55 }
 0x293   :  { %v1083_v33 = vmax.f32 %v1079_v27, 0.0  ;;  %v956_v44 = vxor.u32 2147483648, %v955_v32 }
 0x295   :  { %1277 = vmatpush3.msra.mxu0 %v1083_v33  ;;  %v957_v60 = vsel %vm874_vm15, %v956_v44, %v955_v32 }
 0x296   :  { %1278 = vmatprep.subr.mxu0 %v1390_v0  ;;  %v960_v29 = vsel %vm873_vm0, %v1849_v5, %v957_v60 }
 0x297   :  { %1357 = vcosq.f32 %v960_v29 }
 0x298   :  { %1359 = vsinq.f32 %v960_v29 }
 0x2a4   :  { %v1358_v14 = vpop.eup %1357 }
 0x2a5   :  { %v1360_v22 = vpop.eup %1359  ;;  %v972_v18 = vxor.u32 2147483648, %v1358_v14 }
 0x2a6   :  { %v969_v46 = vxor.u32 2147483648, %v1360_v22 }
 0x2a7   :  { %v973_v30 = vsel %vm971_vm1, %v972_v18, %v1360_v22 }
 0x2a8   :  { %v970_v24 = vsel %vm968_vm2, %v1358_v14, %v969_v46 }
 0x2a9   :  { %v974_v47 = vsel %vm967_vm3, %v970_v24, %v973_v30 }
 0x2aa   :  { %v975_v26 = vsel %vm964_vm4, nan, %v974_v47 }
 0x2ab   :  { %v1082_v36 = vmax.f32 %v975_v26, 0.0 }
 0x2ad   :  { %1279 = vmatpush3.msra.mxu0 %v1082_v36 }
 0x2ae   :  { %1280 = vmatprep.subr.mxu0 %v1390_v0 }
 0x2af   :  { %1281 = vmatpush3.msra.mxu0 %v1081_v61 }
 0x2b0   :  { %1282 = vmatprep.subr.mxu0 %v1390_v0 }
 0x2b1   :  { %1283 = vmatpush3.msra.mxu0 %v1080_v23 }
 0x2b2   :  { %1285 = vmatmul.mubr.msk.f32.vlgmr.msra.gmra.mxu0 %vm562_vm7, %v1089_v38 }
 0x372   :  { %v1167_v5 = vpop.f32.mrf.mxu0 }
 0x373   :  { %1171 = vst [vmem:[#allocation5] sm:$0x7] %v1167_v5 }
 0x374   :  { %v1286_v40 = vpop.f32.mrf.mxu0 }
 0x375   :  { %1372 = shalt.err (!%p1369_p4)
}
 0x376   :  { %1181 = dma.vmem_to_hbm [thread:$0]  %s1179_s7, 64, %s2081_s4, [#allocation6]  }
 0x377   :  { %1381 = dma.done.wait [#allocation6], 64  }
 0x378   :  { %1382 = vsyncadd [#allocation6], 4294967232 }
 0x379   :  { %1185 = vsyncpa [#allocation6], 1 }

</bundles_post_ra>
